<compile_context>
chip_gen: v7x
topology: tpu7x:2x2x1
jax: 0.10.0
libtpu: 0.0.40
codegen_flags: <defaults>
</compile_context>

<pallas_src>
import functools
import math

import jax
import jax.numpy as jnp
from jax import lax
from jax.experimental import pallas as pl
from jax.experimental.pallas import tpu as pltpu

LN_EPS = 1e-5
_SQRT_HALF = 0.7071067811865476  # 1/sqrt(2)


def _round_up(a, b):
    return (a + b - 1) // b * b


def _gelu_exact(h):
    # Exact (erf-based) GELU, matching torch.nn.GELU default.
    return 0.5 * h * (1.0 + lax.erf(h * _SQRT_HALF))


def _gelu_tanh(h):
    # tanh-approx GELU (EUP path); numerics knob for VALU-bound shapes.
    return jax.nn.gelu(h, approximate=True)


def _mixer_kernel(x_ref, g_ref, beta_ref, ws_ref, bs_ref,
                  wc1_ref, bc1_ref, wc2_ref, bc2_ref, o_ref,
                  *, c_real, h_chunk, n_h_chunks, approx_gelu):
    gelu = _gelu_tanh if approx_gelu else _gelu_exact

    x = x_ref[...].astype(jnp.float32)      # (tm, Cp); padded lanes/rows are 0

    # --- LayerNorm over the real channel count -------------------------------
    # Padded channel lanes of x are exactly zero, so summing across the padded
    # width equals summing across the real C channels (no lane mask needed).
    inv_c = 1.0 / c_real
    mean = jnp.sum(x, axis=-1, keepdims=True) * inv_c
    mean_sq = jnp.sum(x * x, axis=-1, keepdims=True) * inv_c
    var = mean_sq - mean * mean
    # NOTE: rows beyond the real M are all-zero -> var == 0 -> rsqrt(eps) is a
    # large but finite value.  Those rows are sliced away by the wrapper, so
    # this is only (finite) wasted compute, never a NaN path.
    xn = (x - mean) * lax.rsqrt(var + LN_EPS) * g_ref[...] + beta_ref[...]
    # gamma/beta are zero-padded -> xn stays exactly 0 on padded channel lanes.

    # --- sequence mixer: x1 = xn + GELU(xn @ Ws + bs) (Dropout = identity) ---
    h1 = jnp.dot(xn.astype(ws_ref.dtype), ws_ref[...],
                 preferred_element_type=jnp.float32) + bs_ref[...]
    x1 = xn + gelu(h1)

    # --- channel mixer: x2 = x1 + GELU(x1 @ Wc1 + bc1) @ Wc2 + bc2 -----------
    # The hidden (2*d_model) dimension is processed in static h_chunk-wide
    # slices so the live (tm, H) f32 intermediate never exceeds (tm, h_chunk).
    # Static ref slices are zero-cost views, and the y2 accumulation chain
    # keeps each chunk's h2 short-lived.
    x1_mxu = x1.astype(wc1_ref.dtype)
    y2 = jnp.zeros_like(x)
    for ci in range(n_h_chunks):
        lo = ci * h_chunk
        h2 = jnp.dot(x1_mxu, wc1_ref[:, lo:lo + h_chunk],
                     preferred_element_type=jnp.float32)
        h2 = gelu(h2 + bc1_ref[:, lo:lo + h_chunk]).astype(wc2_ref.dtype)
        y2 = y2 + jnp.dot(h2, wc2_ref[lo:lo + h_chunk, :],
                          preferred_element_type=jnp.float32)
    x2 = x1 + y2 + bc2_ref[...]

    # --- final residual with the original (un-normalized) input --------------
    o_ref[...] = (x2 + x).astype(o_ref.dtype)


def _vmem_budget(tm):
    """Per-generation VMEM limit and default row tile."""
    try:
        cap = int(pltpu.get_tpu_info().vmem_capacity_bytes)
    except Exception:
        cap = 64 * 1024 * 1024            # conservative: v7x-class 64 MiB / TC
    if tm is None:
        tm = 512 if cap > 96 * 1024 * 1024 else 256
    limit = max(32 * 1024 * 1024, min(int(0.625 * cap), 96 * 1024 * 1024))
    return tm, limit


def _pick_h_chunk(hp):
    """Largest multiple of 128 that divides hp and is <= 512."""
    k = hp // 128
    for m in (4, 3, 2, 1):
        if k % m == 0:
            return 128 * m
    return 128


def mamba_mixer_block(x, gamma, beta, w_seq, b_seq, w_c1, b_c1, w_c2, b_c2,
                      *, tm=None, mxu_dtype=jnp.bfloat16, approx_gelu=False,
                      single_buffer_weights=True):
    """x: (B, S, C).  Weights are in torch nn.Linear layout (out_f, in_f).

    mxu_dtype: matmul operand dtype (bf16 default; pass None / jnp.float32 for
    full-f32 matmuls if bit-closeness to the torch forward matters).
    approx_gelu: tanh-approx GELU (EUP slot) instead of exact erf (VPU).
    """
    B, S, C = x.shape
    H = w_c1.shape[0]                       # 2 * d_model
    M = B * S
    assert M > 0

    # Lane-dense (128-multiple) channel / hidden dims.  (For tiny C < 128 on
    # v5e, unpadded full-dim lane blocks are also legal and save padded MXU
    # work; not taken here -- measure before switching.)
    cp = C if C % 128 == 0 else _round_up(C, 128)
    hp = H if H % 128 == 0 else _round_up(H, 128)

    tm, vmem_limit = _vmem_budget(tm)
    tm_eff = min(tm, _round_up(M, 8))
    # Force >=2 grid steps when M permits so the "parallel" row axis can be
    # sharded across both TensorCores on v7x.
    if M >= 256 and -(-M // tm_eff) < 2:
        tm_eff = _round_up(-(-M // 2), 128)
    mp = _round_up(M, tm_eff)
    grid = mp // tm_eff

    h_chunk = _pick_h_chunk(hp)
    n_h_chunks = hp // h_chunk

    wdt = jnp.float32 if mxu_dtype is None else mxu_dtype

    def pad2(a, rows, cols, dt=jnp.float32):
        a = a.astype(dt)
        pr, pc = rows - a.shape[0], cols - a.shape[1]
        if pr or pc:
            a = jnp.pad(a, ((0, pr), (0, pc)))
        return a

    # Only pad the activations when actually needed (avoids an extra HBM round
    # trip of the activation tensor on both sides of the kernel).
    xm = x.reshape(M, C)
    needs_pad = (mp != M) or (cp != C)
    if needs_pad:
        xm = jnp.pad(xm, ((0, mp - M), (0, cp - C)))

    g2 = pad2(gamma.reshape(1, C), 1, cp)
    be2 = pad2(beta.reshape(1, C), 1, cp)
    ws = pad2(w_seq.T, cp, cp, wdt)         # (Cp, Cp), y = x @ W
    bs = pad2(b_seq.reshape(1, C), 1, cp)
    wc1 = pad2(w_c1.T, cp, hp, wdt)         # (Cp, Hp)
    bc1 = pad2(b_c1.reshape(1, H), 1, hp)
    wc2 = pad2(w_c2.T, hp, cp, wdt)         # (Hp, Cp)
    bc2 = pad2(b_c2.reshape(1, C), 1, cp)

    itemsize = jnp.dtype(x.dtype).itemsize
    cost = pl.CostEstimate(
        flops=2 * M * (C * C + 2 * C * H),
        transcendentals=M * (C + H),
        bytes_accessed=int(2 * M * C * itemsize
                           + (C * C + 2 * C * H) * jnp.dtype(wdt).itemsize
                           + (3 * C + H) * 4),
    )

    kernel = functools.partial(_mixer_kernel, c_real=C, h_chunk=h_chunk,
                               n_h_chunks=n_h_chunks, approx_gelu=approx_gelu)

    def build_and_run(single_buffer):
        const_kwargs = {}
        if single_buffer:
            # Grid-invariant operands are fetched exactly once; single
            # buffering halves their VMEM footprint at zero cost.
            const_kwargs = dict(pipeline_mode=pl.Buffered(1))

        def const_spec(shape):
            return pl.BlockSpec(shape, lambda i: (0, 0), **const_kwargs)

        return pl.pallas_call(
            kernel,
            out_shape=jax.ShapeDtypeStruct((mp, cp), x.dtype),
            grid_spec=pltpu.PrefetchScalarGridSpec(
                num_scalar_prefetch=0,
                grid=(grid,),
                in_specs=[
                    pl.BlockSpec((tm_eff, cp), lambda i: (i, 0)),   # x tile
                    const_spec((1, cp)),                            # gamma
                    const_spec((1, cp)),                            # beta
                    const_spec((cp, cp)),                           # Ws^T
                    const_spec((1, cp)),                            # bs
                    const_spec((cp, hp)),                           # Wc1^T
                    const_spec((1, hp)),                            # bc1
                    const_spec((hp, cp)),                           # Wc2^T
                    const_spec((1, cp)),                            # bc2
                ],
                out_specs=pl.BlockSpec((tm_eff, cp), lambda i: (i, 0)),
            ),
            compiler_params=pltpu.CompilerParams(
                dimension_semantics=("parallel",),
                vmem_limit_bytes=vmem_limit,
            ),
            cost_estimate=cost,
        )(xm, g2, be2, ws, bs, wc1, bc1, wc2, bc2)

    if single_buffer_weights:
        try:
            out = build_and_run(True)
        except Exception:
            # Fallback if this Mosaic build rejects pl.Buffered(1) on a
            # top-level pallas_call BlockSpec: correctness is unaffected, the
            # constants are just double-buffered again.
            out = build_and_run(False)
    else:
        out = build_and_run(False)

    if needs_pad:
        out = out[:M, :C]
    return out.reshape(B, S, C)


def _reference(x, gamma, beta, w_seq, b_seq, w_c1, b_c1, w_c2, b_c2,
               mxu_dtype=None):
    """Pure-JAX reference matching the torch module's forward (eval mode)."""
    xf = x.astype(jnp.float32)
    mean = jnp.mean(xf, axis=-1, keepdims=True)
    var = jnp.mean((xf - mean) ** 2, axis=-1, keepdims=True)
    xn = (xf - mean) * lax.rsqrt(var + LN_EPS) * gamma + beta

    def mm(a, w):
        if mxu_dtype is not None:
            return jnp.dot(a.astype(mxu_dtype), w.T.astype(mxu_dtype),
                           preferred_element_type=jnp.float32)
        return a @ w.T

    x1 = xn + _gelu_exact(mm(xn, w_seq) + b_seq)
    h = _gelu_exact(mm(x1, w_c1) + b_c1)
    x2 = x1 + mm(h, w_c2) + b_c2
    return (x2 + xf).astype(x.dtype)


def _make_params(key, C):
    H = 2 * C
    kg, kb, k1, k2, k3, k4, k5, k6 = jax.random.split(key, 8)
    s_in = 1.0 / math.sqrt(C)
    s_h = 1.0 / math.sqrt(H)
    gamma = 1.0 + 0.1 * jax.random.normal(kg, (C,), jnp.float32)
    beta = 0.1 * jax.random.normal(kb, (C,), jnp.float32)
    # torch nn.Linear layout: (out_features, in_features)
    w_seq = jax.random.normal(k1, (C, C), jnp.float32) * s_in
    b_seq = jax.random.normal(k2, (C,), jnp.float32) * s_in
    w_c1 = jax.random.normal(k3, (H, C), jnp.float32) * s_in
    b_c1 = jax.random.normal(k4, (H,), jnp.float32) * s_in
    w_c2 = jax.random.normal(k5, (C, H), jnp.float32) * s_h
    b_c2 = jax.random.normal(k6, (C,), jnp.float32) * s_h
    return gamma, beta, w_seq, b_seq, w_c1, b_c1, w_c2, b_c2


def _check_case(key, B, S, C):
    kx, kp = jax.random.split(key)
    x = jax.random.normal(kx, (B, S, C), dtype=jnp.float32)
    params = _make_params(kp, C)

    out = mamba_mixer_block(x, *params)
    out = jax.block_until_ready(out)
    assert out.shape == (B, S, C)
    assert bool(jnp.all(jnp.isfinite(out))), f"non-finite output at C={C}"

    # 1) Structural check vs. a reference using the same bf16-operand /
    #    f32-accumulate matmul numerics (tight tolerance).
    ref_bf16 = _reference(x, *params, mxu_dtype=jnp.bfloat16)
    assert jnp.allclose(out, ref_bf16, atol=1e-2, rtol=1e-2), \
        f"mismatch vs bf16-MXU reference at C={C}"

    # 2) Semantic check vs. exact f32 torch-equivalent math (loose tolerance
    #    absorbs bf16 matmul-operand rounding).
    ref_f32 = _reference(x, *params)
    assert jnp.allclose(out, ref_f32, atol=8e-2, rtol=8e-2), \
        f"mismatch vs f32 reference at C={C}"


if __name__ == "__main__":
    key = jax.random.PRNGKey(0)
    k1, k2 = jax.random.split(key)

    # Small config consistent with the projector module: d_model=32, B*S=16
    # (exercises the padded-lane path, single grid step).
    _check_case(k1, B=2, S=8, C=32)

    # Larger config exercising the chunked hidden loop (2*d_model=768 -> two
    # 384-wide chunks), the multi-step "parallel" row grid and the
    # no-padding fast path (C % 128 == 0, M % tm == 0).
    _check_case(k2, B=2, S=256, C=384)

    print("KERNEL_OK")
</pallas_src>

<mosaic_0001>
module attributes {stable_mosaic.version = 11 : i64} {
  func.func @_mixer_kernel(%arg0: i32, %arg1: memref<16x128xf32, #tpu.memory_space<vmem>>, %arg2: memref<1x128xf32, #tpu.memory_space<vmem>>, %arg3: memref<1x128xf32, #tpu.memory_space<vmem>>, %arg4: memref<128x128xbf16, #tpu.memory_space<vmem>>, %arg5: memref<1x128xf32, #tpu.memory_space<vmem>>, %arg6: memref<128x128xbf16, #tpu.memory_space<vmem>>, %arg7: memref<1x128xf32, #tpu.memory_space<vmem>>, %arg8: memref<128x128xbf16, #tpu.memory_space<vmem>>, %arg9: memref<1x128xf32, #tpu.memory_space<vmem>>, %arg10: memref<16x128xf32, #tpu.memory_space<vmem>>) attributes {dimension_semantics = [#tpu.dimension_semantics<parallel>], iteration_bounds = array<i64: 1>, scalar_prefetch = 0 : i64, scratch_operands = 0 : i64, tpu.core_type = #tpu.core_type<tc>, window_params = [{transform_indices = @transform_0, window_bounds = array<i64: 16, 128>}, {pipeline_mode = #tpu.pipeline_mode<synchronous>, transform_indices = @transform_1, window_bounds = array<i64: 1, 128>}, {pipeline_mode = #tpu.pipeline_mode<synchronous>, transform_indices = @transform_2, window_bounds = array<i64: 1, 128>}, {pipeline_mode = #tpu.pipeline_mode<synchronous>, transform_indices = @transform_3, window_bounds = array<i64: 128, 128>}, {pipeline_mode = #tpu.pipeline_mode<synchronous>, transform_indices = @transform_4, window_bounds = array<i64: 1, 128>}, {pipeline_mode = #tpu.pipeline_mode<synchronous>, transform_indices = @transform_5, window_bounds = array<i64: 128, 128>}, {pipeline_mode = #tpu.pipeline_mode<synchronous>, transform_indices = @transform_6, window_bounds = array<i64: 1, 128>}, {pipeline_mode = #tpu.pipeline_mode<synchronous>, transform_indices = @transform_7, window_bounds = array<i64: 128, 128>}, {pipeline_mode = #tpu.pipeline_mode<synchronous>, transform_indices = @transform_8, window_bounds = array<i64: 1, 128>}, {transform_indices = @transform_9, window_bounds = array<i64: 16, 128>}]} {
    %c0 = arith.constant 0 : index
    %c0_0 = arith.constant 0 : index
    %0 = vector.load %arg1[%c0, %c0_0] : memref<16x128xf32, #tpu.memory_space<vmem>>, vector<16x128xf32>
    %cst = arith.constant dense<0.000000e+00> : vector<16xf32>
    %1 = vector.multi_reduction <add>, %0, %cst [1] : vector<16x128xf32> to vector<16xf32>
    %2 = vector.shape_cast %1 : vector<16xf32> to vector<16x1xf32>
    %cst_1 = arith.constant 3.125000e-02 : f32
    %3 = vector.broadcast %cst_1 : f32 to vector<16x1xf32>
    %4 = arith.mulf %2, %3 : vector<16x1xf32>
    %5 = arith.mulf %0, %0 : vector<16x128xf32>
    %cst_2 = arith.constant dense<0.000000e+00> : vector<16xf32>
    %6 = vector.multi_reduction <add>, %5, %cst_2 [1] : vector<16x128xf32> to vector<16xf32>
    %7 = vector.shape_cast %6 : vector<16xf32> to vector<16x1xf32>
    %cst_3 = arith.constant 3.125000e-02 : f32
    %8 = vector.broadcast %cst_3 : f32 to vector<16x1xf32>
    %9 = arith.mulf %7, %8 : vector<16x1xf32>
    %10 = arith.mulf %4, %4 : vector<16x1xf32>
    %11 = arith.subf %9, %10 : vector<16x1xf32>
    %12 = vector.broadcast %4 : vector<16x1xf32> to vector<16x128xf32>
    %13 = arith.subf %0, %12 : vector<16x128xf32>
    %cst_4 = arith.constant 9.99999974E-6 : f32
    %14 = vector.broadcast %cst_4 : f32 to vector<16x1xf32>
    %15 = arith.addf %11, %14 : vector<16x1xf32>
    %16 = math.rsqrt %15 : vector<16x1xf32>
    %17 = vector.broadcast %16 : vector<16x1xf32> to vector<16x128xf32>
    %18 = arith.mulf %13, %17 : vector<16x128xf32>
    %c0_5 = arith.constant 0 : index
    %c0_6 = arith.constant 0 : index
    %19 = vector.load %arg2[%c0_5, %c0_6] : memref<1x128xf32, #tpu.memory_space<vmem>>, vector<1x128xf32>
    %20 = vector.broadcast %19 : vector<1x128xf32> to vector<16x128xf32>
    %21 = arith.mulf %18, %20 : vector<16x128xf32>
    %c0_7 = arith.constant 0 : index
    %c0_8 = arith.constant 0 : index
    %22 = vector.load %arg3[%c0_7, %c0_8] : memref<1x128xf32, #tpu.memory_space<vmem>>, vector<1x128xf32>
    %23 = vector.broadcast %22 : vector<1x128xf32> to vector<16x128xf32>
    %24 = arith.addf %21, %23 : vector<16x128xf32>
    %25 = arith.truncf %24 : vector<16x128xf32> to vector<16x128xbf16>
    %c0_9 = arith.constant 0 : index
    %c0_10 = arith.constant 0 : index
    %26 = vector.load %arg4[%c0_9, %c0_10] : memref<128x128xbf16, #tpu.memory_space<vmem>>, vector<128x128xbf16>
    %cst_11 = arith.constant dense<0.000000e+00> : vector<16x128xf32>
    %27 = tpu.matmul %25, %26, %cst_11 {dimension_numbers = #tpu.dot_dimension_numbers<[1], [0], [0], [1], [0, 0, 1, 1], [], []>} : vector<16x128xbf16>, vector<128x128xbf16>, vector<16x128xf32> -> vector<16x128xf32>
    %c0_12 = arith.constant 0 : index
    %c0_13 = arith.constant 0 : index
    %28 = vector.load %arg5[%c0_12, %c0_13] : memref<1x128xf32, #tpu.memory_space<vmem>>, vector<1x128xf32>
    %29 = vector.broadcast %28 : vector<1x128xf32> to vector<16x128xf32>
    %30 = arith.addf %27, %29 : vector<16x128xf32>
    %cst_14 = arith.constant 5.000000e-01 : f32
    %31 = vector.broadcast %cst_14 : f32 to vector<16x128xf32>
    %32 = arith.mulf %31, %30 : vector<16x128xf32>
    %cst_15 = arith.constant 0.707106769 : f32
    %33 = vector.broadcast %cst_15 : f32 to vector<16x128xf32>
    %34 = arith.mulf %30, %33 : vector<16x128xf32>
    %35 = math.erf %34 : vector<16x128xf32>
    %cst_16 = arith.constant 1.000000e+00 : f32
    %36 = vector.broadcast %cst_16 : f32 to vector<16x128xf32>
    %37 = arith.addf %36, %35 : vector<16x128xf32>
    %38 = arith.mulf %32, %37 : vector<16x128xf32>
    %39 = arith.addf %24, %38 : vector<16x128xf32>
    %40 = arith.truncf %39 : vector<16x128xf32> to vector<16x128xbf16>
    %cst_17 = arith.constant 0.000000e+00 : f32
    %41 = vector.broadcast %cst_17 : f32 to vector<16x128xf32>
    %c0_18 = arith.constant 0 : index
    %c0_19 = arith.constant 0 : index
    %42 = vector.load %arg6[%c0_18, %c0_19] : memref<128x128xbf16, #tpu.memory_space<vmem>>, vector<128x128xbf16>
    %cst_20 = arith.constant dense<0.000000e+00> : vector<16x128xf32>
    %43 = tpu.matmul %40, %42, %cst_20 {dimension_numbers = #tpu.dot_dimension_numbers<[1], [0], [0], [1], [0, 0, 1, 1], [], []>} : vector<16x128xbf16>, vector<128x128xbf16>, vector<16x128xf32> -> vector<16x128xf32>
    %c0_21 = arith.constant 0 : index
    %c0_22 = arith.constant 0 : index
    %44 = vector.load %arg7[%c0_21, %c0_22] : memref<1x128xf32, #tpu.memory_space<vmem>>, vector<1x128xf32>
    %45 = vector.broadcast %44 : vector<1x128xf32> to vector<16x128xf32>
    %46 = arith.addf %43, %45 : vector<16x128xf32>
    %cst_23 = arith.constant 5.000000e-01 : f32
    %47 = vector.broadcast %cst_23 : f32 to vector<16x128xf32>
    %48 = arith.mulf %47, %46 : vector<16x128xf32>
    %cst_24 = arith.constant 0.707106769 : f32
    %49 = vector.broadcast %cst_24 : f32 to vector<16x128xf32>
    %50 = arith.mulf %46, %49 : vector<16x128xf32>
    %51 = math.erf %50 : vector<16x128xf32>
    %cst_25 = arith.constant 1.000000e+00 : f32
    %52 = vector.broadcast %cst_25 : f32 to vector<16x128xf32>
    %53 = arith.addf %52, %51 : vector<16x128xf32>
    %54 = arith.mulf %48, %53 : vector<16x128xf32>
    %55 = arith.truncf %54 : vector<16x128xf32> to vector<16x128xbf16>
    %c0_26 = arith.constant 0 : index
    %c0_27 = arith.constant 0 : index
    %56 = vector.load %arg8[%c0_26, %c0_27] : memref<128x128xbf16, #tpu.memory_space<vmem>>, vector<128x128xbf16>
    %cst_28 = arith.constant dense<0.000000e+00> : vector<16x128xf32>
    %57 = tpu.matmul %55, %56, %cst_28 {dimension_numbers = #tpu.dot_dimension_numbers<[1], [0], [0], [1], [0, 0, 1, 1], [], []>} : vector<16x128xbf16>, vector<128x128xbf16>, vector<16x128xf32> -> vector<16x128xf32>
    %58 = arith.addf %41, %57 : vector<16x128xf32>
    %59 = arith.addf %39, %58 : vector<16x128xf32>
    %c0_29 = arith.constant 0 : index
    %c0_30 = arith.constant 0 : index
    %60 = vector.load %arg9[%c0_29, %c0_30] : memref<1x128xf32, #tpu.memory_space<vmem>>, vector<1x128xf32>
    %61 = vector.broadcast %60 : vector<1x128xf32> to vector<16x128xf32>
    %62 = arith.addf %59, %61 : vector<16x128xf32>
    %63 = arith.addf %62, %0 : vector<16x128xf32>
    %c0_31 = arith.constant 0 : index
    %c0_32 = arith.constant 0 : index
    %64 = vector.load %arg10[%c0_31, %c0_32] : memref<16x128xf32, #tpu.memory_space<vmem>>, vector<16x128xf32>
    tpu.vector_store %arg10[%c0_31, %c0_32], %63 {strides = array<i32>} : memref<16x128xf32, #tpu.memory_space<vmem>>, vector<16x128xf32>,
    return
  }
  func.func @transform_0(%arg0: i32) -> (i32, i32) {
    %c0_i32 = arith.constant 0 : i32
    %c0_i32_0 = arith.constant 0 : i32
    return %arg0, %c0_i32 : i32, i32
  }
  func.func @transform_1(%arg0: i32) -> (i32, i32) {
    %c0_i32 = arith.constant 0 : i32
    %c0_i32_0 = arith.constant 0 : i32
    %c0_i32_1 = arith.constant 0 : i32
    return %c0_i32, %c0_i32_0 : i32, i32
  }
  func.func @transform_2(%arg0: i32) -> (i32, i32) {
    %c0_i32 = arith.constant 0 : i32
    %c0_i32_0 = arith.constant 0 : i32
    %c0_i32_1 = arith.constant 0 : i32
    return %c0_i32, %c0_i32_0 : i32, i32
  }
  func.func @transform_3(%arg0: i32) -> (i32, i32) {
    %c0_i32 = arith.constant 0 : i32
    %c0_i32_0 = arith.constant 0 : i32
    %c0_i32_1 = arith.constant 0 : i32
    return %c0_i32, %c0_i32_0 : i32, i32
  }
  func.func @transform_4(%arg0: i32) -> (i32, i32) {
    %c0_i32 = arith.constant 0 : i32
    %c0_i32_0 = arith.constant 0 : i32
    %c0_i32_1 = arith.constant 0 : i32
    return %c0_i32, %c0_i32_0 : i32, i32
  }
  func.func @transform_5(%arg0: i32) -> (i32, i32) {
    %c0_i32 = arith.constant 0 : i32
    %c0_i32_0 = arith.constant 0 : i32
    %c0_i32_1 = arith.constant 0 : i32
    return %c0_i32, %c0_i32_0 : i32, i32
  }
  func.func @transform_6(%arg0: i32) -> (i32, i32) {
    %c0_i32 = arith.constant 0 : i32
    %c0_i32_0 = arith.constant 0 : i32
    %c0_i32_1 = arith.constant 0 : i32
    return %c0_i32, %c0_i32_0 : i32, i32
  }
  func.func @transform_7(%arg0: i32) -> (i32, i32) {
    %c0_i32 = arith.constant 0 : i32
    %c0_i32_0 = arith.constant 0 : i32
    %c0_i32_1 = arith.constant 0 : i32
    return %c0_i32, %c0_i32_0 : i32, i32
  }
  func.func @transform_8(%arg0: i32) -> (i32, i32) {
    %c0_i32 = arith.constant 0 : i32
    %c0_i32_0 = arith.constant 0 : i32
    %c0_i32_1 = arith.constant 0 : i32
    return %c0_i32, %c0_i32_0 : i32, i32
  }
  func.func @transform_9(%arg0: i32) -> (i32, i32) {
    %c0_i32 = arith.constant 0 : i32
    %c0_i32_0 = arith.constant 0 : i32
    return %arg0, %c0_i32 : i32, i32
  }
}

module attributes {stable_mosaic.version = 11 : i64} {
  func.func @_mixer_kernel(%arg0: i32, %arg1: memref<16x128xf32, #tpu.memory_space<vmem>>, %arg2: memref<1x128xf32, #tpu.memory_space<vmem>>, %arg3: memref<1x128xf32, #tpu.memory_space<vmem>>, %arg4: memref<128x128xbf16, #tpu.memory_space<vmem>>, %arg5: memref<1x128xf32, #tpu.memory_space<vmem>>, %arg6: memref<128x128xbf16, #tpu.memory_space<vmem>>, %arg7: memref<1x128xf32, #tpu.memory_space<vmem>>, %arg8: memref<128x128xbf16, #tpu.memory_space<vmem>>, %arg9: memref<1x128xf32, #tpu.memory_space<vmem>>, %arg10: memref<16x128xf32, #tpu.memory_space<vmem>>) attributes {dimension_semantics = [#tpu.dimension_semantics<parallel>], iteration_bounds = array<i64: 1>, scalar_prefetch = 0 : i64, scratch_operands = 0 : i64, tpu.core_type = #tpu.core_type<tc>, window_params = [{transform_indices = @transform_0, window_bounds = array<i64: 16, 128>}, {pipeline_mode = #tpu.pipeline_mode<synchronous>, transform_indices = @transform_1, window_bounds = array<i64: 1, 128>}, {pipeline_mode = #tpu.pipeline_mode<synchronous>, transform_indices = @transform_2, window_bounds = array<i64: 1, 128>}, {pipeline_mode = #tpu.pipeline_mode<synchronous>, transform_indices = @transform_3, window_bounds = array<i64: 128, 128>}, {pipeline_mode = #tpu.pipeline_mode<synchronous>, transform_indices = @transform_4, window_bounds = array<i64: 1, 128>}, {pipeline_mode = #tpu.pipeline_mode<synchronous>, transform_indices = @transform_5, window_bounds = array<i64: 128, 128>}, {pipeline_mode = #tpu.pipeline_mode<synchronous>, transform_indices = @transform_6, window_bounds = array<i64: 1, 128>}, {pipeline_mode = #tpu.pipeline_mode<synchronous>, transform_indices = @transform_7, window_bounds = array<i64: 128, 128>}, {pipeline_mode = #tpu.pipeline_mode<synchronous>, transform_indices = @transform_8, window_bounds = array<i64: 1, 128>}, {transform_indices = @transform_9, window_bounds = array<i64: 16, 128>}]} {
    %c0 = arith.constant 0 : index
    %c0_0 = arith.constant 0 : index
    %0 = vector.load %arg1[%c0, %c0_0] : memref<16x128xf32, #tpu.memory_space<vmem>>, vector<16x128xf32>
    %cst = arith.constant dense<0.000000e+00> : vector<16xf32>
    %1 = vector.multi_reduction <add>, %0, %cst [1] : vector<16x128xf32> to vector<16xf32>
    %2 = vector.shape_cast %1 : vector<16xf32> to vector<16x1xf32>
    %cst_1 = arith.constant 3.125000e-02 : f32
    %3 = vector.broadcast %cst_1 : f32 to vector<16x1xf32>
    %4 = arith.mulf %2, %3 : vector<16x1xf32>
    %5 = arith.mulf %0, %0 : vector<16x128xf32>
    %cst_2 = arith.constant dense<0.000000e+00> : vector<16xf32>
    %6 = vector.multi_reduction <add>, %5, %cst_2 [1] : vector<16x128xf32> to vector<16xf32>
    %7 = vector.shape_cast %6 : vector<16xf32> to vector<16x1xf32>
    %cst_3 = arith.constant 3.125000e-02 : f32
    %8 = vector.broadcast %cst_3 : f32 to vector<16x1xf32>
    %9 = arith.mulf %7, %8 : vector<16x1xf32>
    %10 = arith.mulf %4, %4 : vector<16x1xf32>
    %11 = arith.subf %9, %10 : vector<16x1xf32>
    %12 = vector.broadcast %4 : vector<16x1xf32> to vector<16x128xf32>
    %13 = arith.subf %0, %12 : vector<16x128xf32>
    %cst_4 = arith.constant 9.99999974E-6 : f32
    %14 = vector.broadcast %cst_4 : f32 to vector<16x1xf32>
    %15 = arith.addf %11, %14 : vector<16x1xf32>
    %16 = math.rsqrt %15 : vector<16x1xf32>
    %17 = vector.broadcast %16 : vector<16x1xf32> to vector<16x128xf32>
    %18 = arith.mulf %13, %17 : vector<16x128xf32>
    %c0_5 = arith.constant 0 : index
    %c0_6 = arith.constant 0 : index
    %19 = vector.load %arg2[%c0_5, %c0_6] : memref<1x128xf32, #tpu.memory_space<vmem>>, vector<1x128xf32>
    %20 = vector.broadcast %19 : vector<1x128xf32> to vector<16x128xf32>
    %21 = arith.mulf %18, %20 : vector<16x128xf32>
    %c0_7 = arith.constant 0 : index
    %c0_8 = arith.constant 0 : index
    %22 = vector.load %arg3[%c0_7, %c0_8] : memref<1x128xf32, #tpu.memory_space<vmem>>, vector<1x128xf32>
    %23 = vector.broadcast %22 : vector<1x128xf32> to vector<16x128xf32>
    %24 = arith.addf %21, %23 : vector<16x128xf32>
    %25 = arith.truncf %24 : vector<16x128xf32> to vector<16x128xbf16>
    %c0_9 = arith.constant 0 : index
    %c0_10 = arith.constant 0 : index
    %26 = vector.load %arg4[%c0_9, %c0_10] : memref<128x128xbf16, #tpu.memory_space<vmem>>, vector<128x128xbf16>
    %cst_11 = arith.constant dense<0.000000e+00> : vector<16x128xf32>
    %27 = tpu.matmul %25, %26, %cst_11 {dimension_numbers = #tpu.dot_dimension_numbers<[1], [0], [0], [1], [0, 0, 1, 1], [], []>} : vector<16x128xbf16>, vector<128x128xbf16>, vector<16x128xf32> -> vector<16x128xf32>
    %c0_12 = arith.constant 0 : index
    %c0_13 = arith.constant 0 : index
    %28 = vector.load %arg5[%c0_12, %c0_13] : memref<1x128xf32, #tpu.memory_space<vmem>>, vector<1x128xf32>
    %29 = vector.broadcast %28 : vector<1x128xf32> to vector<16x128xf32>
    %30 = arith.addf %27, %29 : vector<16x128xf32>
    %cst_14 = arith.constant 5.000000e-01 : f32
    %31 = vector.broadcast %cst_14 : f32 to vector<16x128xf32>
    %32 = arith.mulf %31, %30 : vector<16x128xf32>
    %cst_15 = arith.constant 0.707106769 : f32
    %33 = vector.broadcast %cst_15 : f32 to vector<16x128xf32>
    %34 = arith.mulf %30, %33 : vector<16x128xf32>
    %35 = math.erf %34 : vector<16x128xf32>
    %cst_16 = arith.constant 1.000000e+00 : f32
    %36 = vector.broadcast %cst_16 : f32 to vector<16x128xf32>
    %37 = arith.addf %36, %35 : vector<16x128xf32>
    %38 = arith.mulf %32, %37 : vector<16x128xf32>
    %39 = arith.addf %24, %38 : vector<16x128xf32>
    %40 = arith.truncf %39 : vector<16x128xf32> to vector<16x128xbf16>
    %cst_17 = arith.constant 0.000000e+00 : f32
    %41 = vector.broadcast %cst_17 : f32 to vector<16x128xf32>
    %c0_18 = arith.constant 0 : index
    %c0_19 = arith.constant 0 : index
    %42 = vector.load %arg6[%c0_18, %c0_19] : memref<128x128xbf16, #tpu.memory_space<vmem>>, vector<128x128xbf16>
    %cst_20 = arith.constant dense<0.000000e+00> : vector<16x128xf32>
    %43 = tpu.matmul %40, %42, %cst_20 {dimension_numbers = #tpu.dot_dimension_numbers<[1], [0], [0], [1], [0, 0, 1, 1], [], []>} : vector<16x128xbf16>, vector<128x128xbf16>, vector<16x128xf32> -> vector<16x128xf32>
    %c0_21 = arith.constant 0 : index
    %c0_22 = arith.constant 0 : index
    %44 = vector.load %arg7[%c0_21, %c0_22] : memref<1x128xf32, #tpu.memory_space<vmem>>, vector<1x128xf32>
    %45 = vector.broadcast %44 : vector<1x128xf32> to vector<16x128xf32>
    %46 = arith.addf %43, %45 : vector<16x128xf32>
    %cst_23 = arith.constant 5.000000e-01 : f32
    %47 = vector.broadcast %cst_23 : f32 to vector<16x128xf32>
    %48 = arith.mulf %47, %46 : vector<16x128xf32>
    %cst_24 = arith.constant 0.707106769 : f32
    %49 = vector.broadcast %cst_24 : f32 to vector<16x128xf32>
    %50 = arith.mulf %46, %49 : vector<16x128xf32>
    %51 = math.erf %50 : vector<16x128xf32>
    %cst_25 = arith.constant 1.000000e+00 : f32
    %52 = vector.broadcast %cst_25 : f32 to vector<16x128xf32>
    %53 = arith.addf %52, %51 : vector<16x128xf32>
    %54 = arith.mulf %48, %53 : vector<16x128xf32>
    %55 = arith.truncf %54 : vector<16x128xf32> to vector<16x128xbf16>
    %c0_26 = arith.constant 0 : index
    %c0_27 = arith.constant 0 : index
    %56 = vector.load %arg8[%c0_26, %c0_27] : memref<128x128xbf16, #tpu.memory_space<vmem>>, vector<128x128xbf16>
    %cst_28 = arith.constant dense<0.000000e+00> : vector<16x128xf32>
    %57 = tpu.matmul %55, %56, %cst_28 {dimension_numbers = #tpu.dot_dimension_numbers<[1], [0], [0], [1], [0, 0, 1, 1], [], []>} : vector<16x128xbf16>, vector<128x128xbf16>, vector<16x128xf32> -> vector<16x128xf32>
    %58 = arith.addf %41, %57 : vector<16x128xf32>
    %59 = arith.addf %39, %58 : vector<16x128xf32>
    %c0_29 = arith.constant 0 : index
    %c0_30 = arith.constant 0 : index
    %60 = vector.load %arg9[%c0_29, %c0_30] : memref<1x128xf32, #tpu.memory_space<vmem>>, vector<1x128xf32>
    %61 = vector.broadcast %60 : vector<1x128xf32> to vector<16x128xf32>
    %62 = arith.addf %59, %61 : vector<16x128xf32>
    %63 = arith.addf %62, %0 : vector<16x128xf32>
    %c0_31 = arith.constant 0 : index
    %c0_32 = arith.constant 0 : index
    %64 = vector.load %arg10[%c0_31, %c0_32] : memref<16x128xf32, #tpu.memory_space<vmem>>, vector<16x128xf32>
    tpu.vector_store %arg10[%c0_31, %c0_32], %63 {strides = array<i32>} : memref<16x128xf32, #tpu.memory_space<vmem>>, vector<16x128xf32>,
    return
  }
  func.func @transform_0(%arg0: i32) -> (i32, i32) {
    %c0_i32 = arith.constant 0 : i32
    %c0_i32_0 = arith.constant 0 : i32
    return %arg0, %c0_i32 : i32, i32
  }
  func.func @transform_1(%arg0: i32) -> (i32, i32) {
    %c0_i32 = arith.constant 0 : i32
    %c0_i32_0 = arith.constant 0 : i32
    %c0_i32_1 = arith.constant 0 : i32
    return %c0_i32, %c0_i32_0 : i32, i32
  }
  func.func @transform_2(%arg0: i32) -> (i32, i32) {
    %c0_i32 = arith.constant 0 : i32
    %c0_i32_0 = arith.constant 0 : i32
    %c0_i32_1 = arith.constant 0 : i32
    return %c0_i32, %c0_i32_0 : i32, i32
  }
  func.func @transform_3(%arg0: i32) -> (i32, i32) {
    %c0_i32 = arith.constant 0 : i32
    %c0_i32_0 = arith.constant 0 : i32
    %c0_i32_1 = arith.constant 0 : i32
    return %c0_i32, %c0_i32_0 : i32, i32
  }
  func.func @transform_4(%arg0: i32) -> (i32, i32) {
    %c0_i32 = arith.constant 0 : i32
    %c0_i32_0 = arith.constant 0 : i32
    %c0_i32_1 = arith.constant 0 : i32
    return %c0_i32, %c0_i32_0 : i32, i32
  }
  func.func @transform_5(%arg0: i32) -> (i32, i32) {
    %c0_i32 = arith.constant 0 : i32
    %c0_i32_0 = arith.constant 0 : i32
    %c0_i32_1 = arith.constant 0 : i32
    return %c0_i32, %c0_i32_0 : i32, i32
  }
  func.func @transform_6(%arg0: i32) -> (i32, i32) {
    %c0_i32 = arith.constant 0 : i32
    %c0_i32_0 = arith.constant 0 : i32
    %c0_i32_1 = arith.constant 0 : i32
    return %c0_i32, %c0_i32_0 : i32, i32
  }
  func.func @transform_7(%arg0: i32) -> (i32, i32) {
    %c0_i32 = arith.constant 0 : i32
    %c0_i32_0 = arith.constant 0 : i32
    %c0_i32_1 = arith.constant 0 : i32
    return %c0_i32, %c0_i32_0 : i32, i32
  }
  func.func @transform_8(%arg0: i32) -> (i32, i32) {
    %c0_i32 = arith.constant 0 : i32
    %c0_i32_0 = arith.constant 0 : i32
    %c0_i32_1 = arith.constant 0 : i32
    return %c0_i32, %c0_i32_0 : i32, i32
  }
  func.func @transform_9(%arg0: i32) -> (i32, i32) {
    %c0_i32 = arith.constant 0 : i32
    %c0_i32_0 = arith.constant 0 : i32
    return %arg0, %c0_i32 : i32, i32
  }
}

</mosaic_0001>

<bundles_post_ra>
// kernel: tpu_custom_call.1
= control target key start
LH: loop header
LB: loop body
LE: loop exit
PB: predicated region body
PF: predicated region fallthrough
CT: control target
= control target key end

     0   :  { %14 = vsyncpa [#allocation3], 0  ;;  %s1006_s0 = inlined_call_operand.hbm [shape: f32[16,128], index: 0, kind: input, shape index: {}]   ;;  %s1007_s1 = inlined_call_operand.vmem [shape: f32[1,128], index: 1, kind: input, shape index: {}]   ;;  %s1008_s2 = inlined_call_operand.vmem [shape: f32[1,128], index: 2, kind: input, shape index: {}]   ;;  %s1009_s3 = inlined_call_operand.hbm [shape: bf16[128,128], index: 3, kind: input, shape index: {}]   ;;  %s1010_s4 = inlined_call_operand.vmem [shape: f32[1,128], index: 4, kind: input, shape index: {}]   ;;  %s1011_s5 = inlined_call_operand.hbm [shape: bf16[128,128], index: 5, kind: input, shape index: {}]   ;;  %s1012_s6 = inlined_call_operand.vmem [shape: f32[1,128], index: 6, kind: input, shape index: {}]   ;;  %s1013_s7 = inlined_call_operand.hbm [shape: bf16[128,128], index: 7, kind: input, shape index: {}]   ;;  %s1014_s8 = inlined_call_operand.vmem [shape: f32[1,128], index: 8, kind: input, shape index: {}]   ;;  %s1015_s9 = inlined_call_operand.hbm [shape: f32[16,128], index: 9, kind: output, shape index: {}]  }
   0x1   :  { %15 = vsyncpa [#allocation6], 0 }
   0x2   :  { %16 = vsyncpa [#allocation9], 0 }
   0x3   :  { %17 = vsyncpa [#allocation4], 0  ;;  %s804_s30 = smov [#allocation5]   ;;  %s686_s13 = scalar_lea.hbm %s1009_s3, 1024 }
   0x4   :  { %s39_s10 = sshll.u32 %s804_s30, 4  ;;  %p687_p0 = scmp.ne.s32.totalorder %s1009_s3, %s686_s13  ;;  %s40_s10 = int_to_ptr.vmem [resolvable:$true] %s39_s10 }
   0x5   :  { %p690_p1 = scmp.lt.u32.totalorder %s686_s13, %s1009_s3 }
   0x7   :  { %p692_p2 = pnand %p690_p1, %p687_p0 }
   0x9   :  { %695 = shalt.err (!%p692_p2)
}
   0xa   :  { %s696_s18 = scalar_lea.vmem %s40_s10, 1024  ;;  %p701_p4 = scmp.lt.s32.totalorder %s40_s10, %s40_s10 }
   0xb   :  { %p697_p3 = scmp.ne.s32.totalorder %s40_s10, %s696_s18  ;;  %p702_p5 = scmp.lt.s32.totalorder %s696_s18, %s696_s18 }
   0xd   :  { %p703_p6 = por %p702_p5, %p701_p4 }
   0xf   :  { %p704_p7 = pnand %p703_p6, %p697_p3 }
  0x11   :  { %707 = shalt.err (!%p704_p7)
}
  0x12   :  { %s805_s19 = smov 64   ;;  %s806_s20 = smov 4  }
  0x13   :  { %45 = dma.hbm_to_vmem [thread:$0]  %s1009_s3, 1024, %s40_s10, [#allocation6], %s805_s19, %s805_s19, %s806_s20  }
  0x14   :  { %s807_s23 = smov [#allocation2]   ;;  %s708_s27 = scalar_lea.hbm %s1006_s0, 256 }
  0x15   :  { %s23_s24 = sshll.u32 %s807_s23, 4  ;;  %p709_p8 = scmp.ne.s32.totalorder %s1006_s0, %s708_s27  ;;  %s24_s24 = int_to_ptr.vmem [resolvable:$true] %s23_s24 }
  0x16   :  { %p712_p9 = scmp.lt.u32.totalorder %s708_s27, %s1006_s0 }
  0x18   :  { %p714_p10 = pnand %p712_p9, %p709_p8 }
  0x1a   :  { %717 = shalt.err (!%p714_p10)
}
  0x1b   :  { %s718_s12 = scalar_lea.vmem %s24_s24, 256  ;;  %p723_p12 = scmp.lt.s32.totalorder %s24_s24, %s24_s24 }
  0x1c   :  { %p719_p11 = scmp.ne.s32.totalorder %s24_s24, %s718_s12  ;;  %p724_p13 = scmp.lt.s32.totalorder %s718_s12, %s718_s12 }
  0x1e   :  { %p725_p0 = por %p724_p13, %p723_p12 }
  0x20   :  { %p726_p1 = pnand %p725_p0, %p719_p11 }
  0x22   :  { %729 = shalt.err (!%p726_p1)
}
  0x23   :  { %s808_s3 = smov 128   ;;  %s809_s10 = smov 8  }
  0x24   :  { %29 = dma.hbm_to_vmem [thread:$0]  %s1006_s0, 256, %s24_s24, [#allocation3], %s808_s3, %s808_s3, %s809_s10  }
  0x25   :  { %s810_s15 = smov [#allocation7]   ;;  %s811_s17 = smov [#allocation8]  }
  0x26   :  { %s53_s16 = sshll.u32 %s810_s15, 4  ;;  %s67_s18 = sshll.u32 %s811_s17, 4  ;;  %s54_s16 = int_to_ptr.vmem [resolvable:$true] %s53_s16  ;;  %s895_s18 = int_to_ptr.vmem [resolvable:$true] %s67_s18 }
  0x27   :  { %s730_s23 = scalar_lea.hbm %s1011_s5, 1024 }
  0x28   :  { %p731_p2 = scmp.ne.s32.totalorder %s1011_s5, %s730_s23  ;;  %p734_p3 = scmp.lt.u32.totalorder %s730_s23, %s1011_s5 }
  0x2a   :  { %p736_p4 = pnand %p734_p3, %p731_p2 }
  0x2c   :  { %739 = shalt.err (!%p736_p4)
}
  0x2d   :  { %s740_s0 = scalar_lea.vmem %s54_s16, 1024  ;;  %p745_p6 = scmp.lt.s32.totalorder %s54_s16, %s54_s16 }
  0x2e   :  { %p741_p5 = scmp.ne.s32.totalorder %s54_s16, %s740_s0  ;;  %p746_p7 = scmp.lt.s32.totalorder %s740_s0, %s740_s0 }
  0x30   :  { %p747_p8 = por %p746_p7, %p745_p6 }
  0x32   :  { %p748_p9 = pnand %p747_p8, %p741_p5 }
  0x34   :  { %751 = shalt.err (!%p748_p9)
}
  0x35   :  { %59 = dma.hbm_to_vmem [thread:$0]  %s1011_s5, 1024, %s54_s16, [#allocation6], %s805_s19, %s805_s19, %s806_s20  }
  0x36   :  { %s752_s12 = scalar_lea.hbm %s1013_s7, 1024 }
  0x37   :  { %p753_p10 = scmp.ne.s32.totalorder %s1013_s7, %s752_s12  ;;  %p756_p11 = scmp.lt.u32.totalorder %s752_s12, %s1013_s7 }
  0x39   :  { %p758_p12 = pnand %p756_p11, %p753_p10 }
  0x3b   :  { %761 = shalt.err (!%p758_p12)
}
  0x3c   :  { %s762_s21 = scalar_lea.vmem %s895_s18, 1024  ;;  %p767_p0 = scmp.lt.s32.totalorder %s895_s18, %s895_s18 }
  0x3d   :  { %p763_p13 = scmp.ne.s32.totalorder %s895_s18, %s762_s21  ;;  %p768_p1 = scmp.lt.s32.totalorder %s762_s21, %s762_s21 }
  0x3f   :  { %p769_p2 = por %p768_p1, %p767_p0 }
  0x41   :  { %p770_p3 = pnand %p769_p2, %p763_p13 }
  0x43   :  { %773 = shalt.err (!%p770_p3)
}
  0x44   :  { %73 = dma.hbm_to_vmem [thread:$0]  %s1013_s7, 1024, %s895_s18, [#allocation9], %s805_s19, %s805_s19, %s806_s20  }
  0x45   :  { %796 = dma.done.wait [#allocation3], 256  }
  0x46   :  { %797 = vsyncadd [#allocation3], 4294967040 }
  0x47   :  { %798 = dma.done.wait [#allocation6], 2048  }
  0x48   :  { %799 = vsyncadd [#allocation6], 4294965248 }
  0x49   :  { %800 = dma.done.wait [#allocation9], 1024  }
  0x4a   :  { %801 = vsyncadd [#allocation9], 4294966272  ;;  %v812_v0 = vmov 0.0   ;;  %v934_v1 = vld [vmem:[#allocation2] sm:$0xff]  ;;  %v936_v2 = vld [vmem:[#allocation2 + $0x8] sm:$0xff]  ;;  %vm813_vm0 = vmmov 0  }
  0x4b   :  { %579 = vmatprep.subr.bf16.mxu0 %v812_v0  ;;  %599 = vmatprep.subr.bf16.mxu1 %v812_v0  ;;  %v97_v3 = vmul.f32 %v934_v1, %v934_v1  ;;  %v98_v4 = vmul.f32 %v936_v2, %v936_v2  ;;  %v650_v5 = vld [vmem:[#allocation5] sm:$0xff]   ;;  %v651_v6 = vld [vmem:[#allocation5 + $0x8] sm:$0xff]   ;;  %v652_v7 = vld [vmem:[#allocation5 + $0x10] sm:$0xff]   ;;  %s814_s25 = smov [#allocation10]  }
  0x4c   :  { %91 = vadd.xlane.f32.xlu0 %v934_v1  ;;  %580 = vmatpush3.bf16.msra.mxu0 %v650_v5  ;;  %v653_v8 = vld [vmem:[#allocation5 + $0x18] sm:$0xff]   ;;  %v654_v9 = vld [vmem:[#allocation5 + $0x20] sm:$0xff]   ;;  %v655_v10 = vld [vmem:[#allocation5 + $0x28] sm:$0xff]   ;;  %s509_s26 = sshll.u32 %s814_s25, 4  ;;  %s510_s26 = int_to_ptr.vmem [resolvable:$true] %s509_s26 }
  0x4d   :  { %99 = vadd.xlane.f32.xlu1 %v97_v3  ;;  %581 = vmatprep.subr.bf16.mxu0 %v812_v0  ;;  %v656_v11 = vld [vmem:[#allocation5 + $0x30] sm:$0xff]   ;;  %v657_v12 = vld [vmem:[#allocation5 + $0x38] sm:$0xff]   ;;  %v658_v13 = vld [vmem:[#allocation7] sm:$0xff]   ;;  %s774_s27 = scalar_lea.vmem %s510_s26, 256  ;;  %p779_p5 = scmp.lt.s32.totalorder %s510_s26, %s510_s26 }
  0x4e   :  { %595 = vmatprep.mubr.msk.bf16.mxu0 %vm813_vm0, %v812_v0  ;;  %615 = vmatprep.mubr.msk.bf16.mxu1 %vm813_vm0, %v812_v0  ;;  %v659_v14 = vld [vmem:[#allocation7 + $0x8] sm:$0xff]   ;;  %v523_v32 = vld [vmem:[%s1007_s1] ss:$0 sm:$0xff]  ;;  %v661_v43 = vld [vmem:[#allocation7 + $0x18] sm:$0xff]   ;;  %p775_p4 = scmp.ne.s32.totalorder %s510_s26, %s774_s27  ;;  %p780_p6 = scmp.lt.s32.totalorder %s774_s27, %s774_s27 }
  0x4f   :  { %600 = vmatpush3.bf16.msra.mxu1 %v658_v13  ;;  %v524_v37 = vld [vmem:[%s1008_s2] ss:$0 sm:$0xff]  ;;  %v662_v44 = vld [vmem:[#allocation7 + $0x20] sm:$0xff]   ;;  %v663_v45 = vld [vmem:[#allocation7 + $0x28] sm:$0xff]  }
  0x50   :  { %93 = vadd.xlane.f32.xlu0 %v936_v2  ;;  %582 = vmatpush3.bf16.msra.mxu0 %v651_v6  ;;  %v660_v42 = vld [vmem:[#allocation7 + $0x10] sm:$0xff]   ;;  %v665_v47 = vld [vmem:[#allocation7 + $0x38] sm:$0xff]   ;;  %v666_v48 = vld [vmem:[#allocation8] sm:$0xff]   ;;  %p781_p7 = por %p780_p6, %p779_p5 }
  0x51   :  { %101 = vadd.xlane.f32.xlu1 %v98_v4  ;;  %583 = vmatprep.subr.bf16.mxu0 %v812_v0  ;;  %v664_v46 = vld [vmem:[#allocation7 + $0x30] sm:$0xff]   ;;  %v667_v49 = vld [vmem:[#allocation8 + $0x8] sm:$0xff]  }
  0x52   :  { %601 = vmatprep.subr.bf16.mxu1 %v812_v0  ;;  %v525_v50 = vld [vmem:[%s1010_s4] ss:$0 sm:$0xff]  ;;  %p782_p8 = pnand %p781_p7, %p775_p4 }
  0x53   :  { %602 = vmatpush3.bf16.msra.mxu1 %v659_v14  ;;  %v672_v13 = vld [vmem:[#allocation8 + $0x30] sm:$0xff]   ;;  %v673_v14 = vld [vmem:[#allocation8 + $0x38] sm:$0xff]  }
  0x54   :  { %584 = vmatpush3.bf16.msra.mxu0 %v652_v7  ;;  %603 = vmatprep.subr.bf16.mxu1 %v812_v0 }
  0x55   :  { %585 = vmatprep.subr.bf16.mxu0 %v812_v0 }
  0x57   :  { %604 = vmatpush3.bf16.msra.mxu1 %v660_v42 }
  0x58   :  { %586 = vmatpush3.bf16.msra.mxu0 %v653_v8  ;;  %605 = vmatprep.subr.bf16.mxu1 %v812_v0 }
  0x59   :  { %587 = vmatprep.subr.bf16.mxu0 %v812_v0 }
  0x5b   :  { %606 = vmatpush3.bf16.msra.mxu1 %v661_v43 }
  0x5c   :  { %588 = vmatpush3.bf16.msra.mxu0 %v654_v9  ;;  %607 = vmatprep.subr.bf16.mxu1 %v812_v0  ;;  %v668_v9 = vld [vmem:[#allocation8 + $0x10] sm:$0xff]  }
  0x5d   :  { %589 = vmatprep.subr.bf16.mxu0 %v812_v0 }
  0x5f   :  { %608 = vmatpush3.bf16.msra.mxu1 %v662_v44 }
  0x60   :  { %590 = vmatpush3.bf16.msra.mxu0 %v655_v10  ;;  %609 = vmatprep.subr.bf16.mxu1 %v812_v0  ;;  %v669_v10 = vld [vmem:[#allocation8 + $0x18] sm:$0xff]  }
  0x61   :  { %591 = vmatprep.subr.bf16.mxu0 %v812_v0 }
  0x63   :  { %610 = vmatpush3.bf16.msra.mxu1 %v663_v45 }
  0x64   :  { %592 = vmatpush3.bf16.msra.mxu0 %v656_v11  ;;  %611 = vmatprep.subr.bf16.mxu1 %v812_v0  ;;  %v670_v11 = vld [vmem:[#allocation8 + $0x20] sm:$0xff]  }
  0x65   :  { %593 = vmatprep.subr.bf16.mxu0 %v812_v0 }
  0x67   :  { %612 = vmatpush3.bf16.msra.mxu1 %v664_v46 }
  0x68   :  { %594 = vmatpush3.bf16.msra.mxu0 %v657_v12  ;;  %613 = vmatprep.subr.bf16.mxu1 %v812_v0  ;;  %v671_v12 = vld [vmem:[#allocation8 + $0x28] sm:$0xff]  }
  0x69   :  { %619 = vmatprep.subr.bf16.mxu0 %v812_v0 }
  0x6b   :  { %614 = vmatpush3.bf16.msra.mxu1 %v665_v47 }
  0xd9   :  { %v92_v15 = vpop.xlane.xlu0 %91 }
  0xda   :  { %v95_v16 = vmul.f32 0.03125, %v92_v15  ;;  %v100_v17 = vpop.xlane.xlu1 %99  ;;  %v534_v15 = vld [vmem:[%s1012_s6] ss:$0 sm:$0xff] }
  0xdb   :  { %v103_v19 = vmul.f32 0.03125, %v100_v17 }
  0xdc   :  { %v105_v18 = vmul.f32 %v95_v16, %v95_v16  ;;  %v109_v29 = vsub.f32 %v934_v1, %v95_v16 }
  0xdd   :  { %v94_v20 = vpop.xlane.xlu0 %93 }
  0xde   :  { %v107_v21 = vsub.f32 %v103_v19, %v105_v18  ;;  %v96_v22 = vmul.f32 0.03125, %v94_v20  ;;  %v102_v23 = vpop.xlane.xlu1 %101 }
  0xdf   :  { %v104_v26 = vmul.f32 0.03125, %v102_v23 }
  0xe0   :  { %v111_v24 = vadd.f32 1e-05, %v107_v21  ;;  %v106_v25 = vmul.f32 %v96_v22, %v96_v22  ;;  %v110_v33 = vsub.f32 %v936_v2, %v96_v22 }
  0xe2   :  { %674 = vrsqrt.f32 %v111_v24  ;;  %v108_v27 = vsub.f32 %v104_v26, %v106_v25 }
  0xe4   :  { %v112_v28 = vadd.f32 1e-05, %v108_v27 }
  0xe6   :  { %676 = vrsqrt.f32 %v112_v28 }
  0xec   :  { %v675_v30 = vpop.eup %674 }
  0xed   :  { %v115_v31 = vmul.f32 %v675_v30, %v109_v29 }
  0xef   :  { %v124_v36 = vmul.f32 %v523_v32, %v115_v31 }
  0xf0   :  { %v677_v34 = vpop.eup %676 }
  0xf1   :  { %v116_v35 = vmul.f32 %v677_v34, %v110_v33  ;;  %v133_v39 = vadd.f32 %v524_v37, %v124_v36  ;;  %v551_v33 = vld [vmem:[%s1014_s8] ss:$0 sm:$0xff] }
  0xf3   :  { %v125_v38 = vmul.f32 %v523_v32, %v116_v35 }
  0xf5   :  { %v134_v40 = vadd.f32 %v524_v37, %v125_v38 }
  0xf7   :  { %v135_v41 = vpack.c.bf16 %v134_v40, %v133_v39 }
  0xf9   :  { %596 = vmatmul.mubr.bf16.vlgmr.msra.gmra.mrb[0].mxu0 %v135_v41 }
  0xfa   :  { %635 = vmatprep.mubr.msk.bf16.mxu0 %vm813_vm0, %v812_v0  ;;  %620 = vmatpush3.bf16.msra.mxu0 %v666_v48 }
  0xfb   :  { %621 = vmatprep.subr.bf16.mxu0 %v812_v0 }
  0xfe   :  { %622 = vmatpush3.bf16.msra.mxu0 %v667_v49 }
  0xff   :  { %623 = vmatprep.subr.bf16.mxu0 %v812_v0 }
 0x102   :  { %624 = vmatpush3.bf16.msra.mxu0 %v668_v9 }
 0x103   :  { %625 = vmatprep.subr.bf16.mxu0 %v812_v0 }
 0x106   :  { %626 = vmatpush3.bf16.msra.mxu0 %v669_v10 }
 0x107   :  { %627 = vmatprep.subr.bf16.mxu0 %v812_v0 }
 0x10a   :  { %628 = vmatpush3.bf16.msra.mxu0 %v670_v11 }
 0x10b   :  { %629 = vmatprep.subr.bf16.mxu0 %v812_v0 }
 0x10e   :  { %630 = vmatpush3.bf16.msra.mxu0 %v671_v12 }
 0x10f   :  { %631 = vmatprep.subr.bf16.mxu0 %v812_v0 }
 0x112   :  { %632 = vmatpush3.bf16.msra.mxu0 %v672_v13 }
 0x113   :  { %633 = vmatprep.subr.bf16.mxu0 %v812_v0 }
 0x116   :  { %634 = vmatpush3.bf16.msra.mxu0 %v673_v14 }
 0x1cc   :  { %v241_v51 = vpop.f32.mrb[0].mxu0 }
 0x1cd   :  { %v242_v52 = vadd.f32 %v525_v50, %v241_v51  ;;  %v597_v53 = vpop.f32.mrb[1].mxu0 }
 0x1ce   :  { %v244_v54 = vpop.f32.mrb[2].mxu0 }
 0x1cf   :  { %v250_v55 = vmul.f32 0.70710677, %v242_v52  ;;  %v245_v56 = vadd.f32 %v525_v50, %v244_v54  ;;  %v598_v57 = vpop.f32.mrb[3].mxu0  ;;  %v248_v60 = vmul.f32 0.5, %v242_v52 }
 0x1d1   :  { %678 = verf.f32 %v250_v55  ;;  %v251_v58 = vmul.f32 0.70710677, %v245_v56  ;;  %v249_v3 = vmul.f32 0.5, %v245_v56 }
 0x1d3   :  { %680 = verf.f32 %v251_v58 }
 0x1db   :  { %v679_v59 = vpop.eup %678 }
 0x1dc   :  { %v254_v61 = vadd.f32 1.0, %v679_v59 }
 0x1dd   :  { %v681_v62 = vpop.eup %680 }
 0x1de   :  { %v256_v63 = vmul.f32 %v254_v61, %v248_v60  ;;  %v255_v4 = vadd.f32 1.0, %v681_v62 }
 0x1e0   :  { %v257_v5 = vmul.f32 %v255_v4, %v249_v3  ;;  %v258_v6 = vadd.f32 %v256_v63, %v133_v39 }
 0x1e2   :  { %v259_v7 = vadd.f32 %v257_v5, %v134_v40 }
 0x1e4   :  { %v260_v8 = vpack.c.bf16 %v259_v7, %v258_v6 }
 0x1e6   :  { %616 = vmatmul.mubr.bf16.vlgmr.msra.gmra.mrb[0].mxu1 %v260_v8 }
 0x2b9   :  { %v366_v16 = vpop.f32.mrb[0].mxu1 }
 0x2ba   :  { %v367_v17 = vadd.f32 %v534_v15, %v366_v16  ;;  %v617_v18 = vpop.f32.mrb[1].mxu1 }
 0x2bb   :  { %v369_v19 = vpop.f32.mrb[2].mxu1 }
 0x2bc   :  { %v375_v20 = vmul.f32 0.70710677, %v367_v17  ;;  %v370_v21 = vadd.f32 %v534_v15, %v369_v19  ;;  %v618_v22 = vpop.f32.mrb[3].mxu1  ;;  %v373_v0 = vmul.f32 0.5, %v367_v17 }
 0x2be   :  { %682 = verf.f32 %v375_v20  ;;  %v376_v23 = vmul.f32 0.70710677, %v370_v21  ;;  %v374_v27 = vmul.f32 0.5, %v370_v21 }
 0x2c0   :  { %684 = verf.f32 %v376_v23 }
 0x2c8   :  { %v683_v24 = vpop.eup %682 }
 0x2c9   :  { %v379_v25 = vadd.f32 1.0, %v683_v24 }
 0x2ca   :  { %v685_v26 = vpop.eup %684 }
 0x2cb   :  { %v380_v28 = vadd.f32 1.0, %v685_v26  ;;  %v381_v29 = vmul.f32 %v379_v25, %v373_v0 }
 0x2cd   :  { %v382_v30 = vmul.f32 %v380_v28, %v374_v27 }
 0x2cf   :  { %v383_v31 = vpack.c.bf16 %v382_v30, %v381_v29 }
 0x2d1   :  { %636 = vmatmul.mubr.bf16.vlgmr.msra.gmra.mrb[4].mxu0 %v383_v31 }
 0x3a4   :  { %v482_v32 = vpop.f32.mrb[4].mxu0 }
 0x3a5   :  { %v489_v34 = vadd.f32 %v482_v32, %v258_v6  ;;  %v637_v35 = vpop.f32.mrb[5].mxu0 }
 0x3a6   :  { %v485_v36 = vpop.f32.mrb[6].mxu0 }
 0x3a7   :  { %v498_v37 = vadd.f32 %v551_v33, %v489_v34  ;;  %v490_v38 = vadd.f32 %v485_v36, %v259_v7  ;;  %v638_v39 = vpop.f32.mrb[7].mxu0 }
 0x3a9   :  { %v500_v40 = vadd.f32 %v498_v37, %v934_v1  ;;  %v499_v41 = vadd.f32 %v551_v33, %v490_v38 }
 0x3ab   :  { %502 = vst [vmem:[#allocation10] sm:$0xff] %v500_v40  ;;  %v501_v42 = vadd.f32 %v499_v41, %v936_v2 }
 0x3ad   :  { %503 = vst [vmem:[#allocation10 + $0x8] sm:$0xff] %v501_v42 }
 0x3ae   :  { %785 = shalt.err (!%p782_p8)
}
 0x3af   :  { %s786_s0 = scalar_lea.hbm %s1015_s9, 256 }
 0x3b0   :  { %p787_p9 = scmp.ne.s32.totalorder %s1015_s9, %s786_s0  ;;  %p790_p10 = scmp.lt.u32.totalorder %s786_s0, %s1015_s9 }
 0x3b2   :  { %p792_p11 = pnand %p790_p10, %p787_p9 }
 0x3b4   :  { %795 = shalt.err (!%p792_p11)
}
 0x3b5   :  { %515 = dma.vmem_to_hbm [thread:$0]  %s510_s26, 256, %s1015_s9, [#allocation4], %s808_s3, %s808_s3, %s809_s10  }
 0x3b6   :  { %802 = dma.done.wait [#allocation4], 256  }
 0x3b7   :  { %803 = vsyncadd [#allocation4], 4294967040 }
 0x3b8   :  { %519 = vsyncpa [#allocation3], 1 }
 0x3b9   :  { %520 = vsyncpa [#allocation6], 1 }
 0x3ba   :  { %521 = vsyncpa [#allocation9], 1 }
 0x3bb   :  { %522 = vsyncpa [#allocation4], 1 }

// kernel: tpu_custom_call.1
= control target key start
LH: loop header
LB: loop body
LE: loop exit
PB: predicated region body
PF: predicated region fallthrough
CT: control target
= control target key end

     0   :  { %14 = vsyncpa [#allocation3], 0  ;;  %s1006_s0 = inlined_call_operand.hbm [shape: f32[16,128], index: 0, kind: input, shape index: {}]   ;;  %s1007_s1 = inlined_call_operand.vmem [shape: f32[1,128], index: 1, kind: input, shape index: {}]   ;;  %s1008_s2 = inlined_call_operand.vmem [shape: f32[1,128], index: 2, kind: input, shape index: {}]   ;;  %s1009_s3 = inlined_call_operand.hbm [shape: bf16[128,128], index: 3, kind: input, shape index: {}]   ;;  %s1010_s4 = inlined_call_operand.vmem [shape: f32[1,128], index: 4, kind: input, shape index: {}]   ;;  %s1011_s5 = inlined_call_operand.hbm [shape: bf16[128,128], index: 5, kind: input, shape index: {}]   ;;  %s1012_s6 = inlined_call_operand.vmem [shape: f32[1,128], index: 6, kind: input, shape index: {}]   ;;  %s1013_s7 = inlined_call_operand.hbm [shape: bf16[128,128], index: 7, kind: input, shape index: {}]   ;;  %s1014_s8 = inlined_call_operand.vmem [shape: f32[1,128], index: 8, kind: input, shape index: {}]   ;;  %s1015_s9 = inlined_call_operand.hbm [shape: f32[16,128], index: 9, kind: output, shape index: {}]  }
   0x1   :  { %15 = vsyncpa [#allocation6], 0 }
   0x2   :  { %16 = vsyncpa [#allocation9], 0 }
   0x3   :  { %17 = vsyncpa [#allocation4], 0  ;;  %s804_s30 = smov [#allocation5]   ;;  %s686_s13 = scalar_lea.hbm %s1009_s3, 1024 }
   0x4   :  { %s39_s10 = sshll.u32 %s804_s30, 4  ;;  %p687_p0 = scmp.ne.s32.totalorder %s1009_s3, %s686_s13  ;;  %s40_s10 = int_to_ptr.vmem [resolvable:$true] %s39_s10 }
   0x5   :  { %p690_p1 = scmp.lt.u32.totalorder %s686_s13, %s1009_s3 }
   0x7   :  { %p692_p2 = pnand %p690_p1, %p687_p0 }
   0x9   :  { %695 = shalt.err (!%p692_p2)
}
   0xa   :  { %s696_s18 = scalar_lea.vmem %s40_s10, 1024  ;;  %p701_p4 = scmp.lt.s32.totalorder %s40_s10, %s40_s10 }
   0xb   :  { %p697_p3 = scmp.ne.s32.totalorder %s40_s10, %s696_s18  ;;  %p702_p5 = scmp.lt.s32.totalorder %s696_s18, %s696_s18 }
   0xd   :  { %p703_p6 = por %p702_p5, %p701_p4 }
   0xf   :  { %p704_p7 = pnand %p703_p6, %p697_p3 }
  0x11   :  { %707 = shalt.err (!%p704_p7)
}
  0x12   :  { %s805_s19 = smov 64   ;;  %s806_s20 = smov 4  }
  0x13   :  { %45 = dma.hbm_to_vmem [thread:$0]  %s1009_s3, 1024, %s40_s10, [#allocation6], %s805_s19, %s805_s19, %s806_s20  }
  0x14   :  { %s807_s23 = smov [#allocation2]   ;;  %s708_s27 = scalar_lea.hbm %s1006_s0, 256 }
  0x15   :  { %s23_s24 = sshll.u32 %s807_s23, 4  ;;  %p709_p8 = scmp.ne.s32.totalorder %s1006_s0, %s708_s27  ;;  %s24_s24 = int_to_ptr.vmem [resolvable:$true] %s23_s24 }
  0x16   :  { %p712_p9 = scmp.lt.u32.totalorder %s708_s27, %s1006_s0 }
  0x18   :  { %p714_p10 = pnand %p712_p9, %p709_p8 }
  0x1a   :  { %717 = shalt.err (!%p714_p10)
}
  0x1b   :  { %s718_s12 = scalar_lea.vmem %s24_s24, 256  ;;  %p723_p12 = scmp.lt.s32.totalorder %s24_s24, %s24_s24 }
  0x1c   :  { %p719_p11 = scmp.ne.s32.totalorder %s24_s24, %s718_s12  ;;  %p724_p13 = scmp.lt.s32.totalorder %s718_s12, %s718_s12 }
  0x1e   :  { %p725_p0 = por %p724_p13, %p723_p12 }
  0x20   :  { %p726_p1 = pnand %p725_p0, %p719_p11 }
  0x22   :  { %729 = shalt.err (!%p726_p1)
}
  0x23   :  { %s808_s3 = smov 128   ;;  %s809_s10 = smov 8  }
  0x24   :  { %29 = dma.hbm_to_vmem [thread:$0]  %s1006_s0, 256, %s24_s24, [#allocation3], %s808_s3, %s808_s3, %s809_s10  }
  0x25   :  { %s810_s15 = smov [#allocation7]   ;;  %s811_s17 = smov [#allocation8]  }
  0x26   :  { %s53_s16 = sshll.u32 %s810_s15, 4  ;;  %s67_s18 = sshll.u32 %s811_s17, 4  ;;  %s54_s16 = int_to_ptr.vmem [resolvable:$true] %s53_s16  ;;  %s895_s18 = int_to_ptr.vmem [resolvable:$true] %s67_s18 }
  0x27   :  { %s730_s23 = scalar_lea.hbm %s1011_s5, 1024 }
  0x28   :  { %p731_p2 = scmp.ne.s32.totalorder %s1011_s5, %s730_s23  ;;  %p734_p3 = scmp.lt.u32.totalorder %s730_s23, %s1011_s5 }
  0x2a   :  { %p736_p4 = pnand %p734_p3, %p731_p2 }
  0x2c   :  { %739 = shalt.err (!%p736_p4)
}
  0x2d   :  { %s740_s0 = scalar_lea.vmem %s54_s16, 1024  ;;  %p745_p6 = scmp.lt.s32.totalorder %s54_s16, %s54_s16 }
  0x2e   :  { %p741_p5 = scmp.ne.s32.totalorder %s54_s16, %s740_s0  ;;  %p746_p7 = scmp.lt.s32.totalorder %s740_s0, %s740_s0 }
  0x30   :  { %p747_p8 = por %p746_p7, %p745_p6 }
  0x32   :  { %p748_p9 = pnand %p747_p8, %p741_p5 }
  0x34   :  { %751 = shalt.err (!%p748_p9)
}
  0x35   :  { %59 = dma.hbm_to_vmem [thread:$0]  %s1011_s5, 1024, %s54_s16, [#allocation6], %s805_s19, %s805_s19, %s806_s20  }
  0x36   :  { %s752_s12 = scalar_lea.hbm %s1013_s7, 1024 }
  0x37   :  { %p753_p10 = scmp.ne.s32.totalorder %s1013_s7, %s752_s12  ;;  %p756_p11 = scmp.lt.u32.totalorder %s752_s12, %s1013_s7 }
  0x39   :  { %p758_p12 = pnand %p756_p11, %p753_p10 }
  0x3b   :  { %761 = shalt.err (!%p758_p12)
}
  0x3c   :  { %s762_s21 = scalar_lea.vmem %s895_s18, 1024  ;;  %p767_p0 = scmp.lt.s32.totalorder %s895_s18, %s895_s18 }
  0x3d   :  { %p763_p13 = scmp.ne.s32.totalorder %s895_s18, %s762_s21  ;;  %p768_p1 = scmp.lt.s32.totalorder %s762_s21, %s762_s21 }
  0x3f   :  { %p769_p2 = por %p768_p1, %p767_p0 }
  0x41   :  { %p770_p3 = pnand %p769_p2, %p763_p13 }
  0x43   :  { %773 = shalt.err (!%p770_p3)
}
  0x44   :  { %73 = dma.hbm_to_vmem [thread:$0]  %s1013_s7, 1024, %s895_s18, [#allocation9], %s805_s19, %s805_s19, %s806_s20  }
  0x45   :  { %796 = dma.done.wait [#allocation3], 256  }
  0x46   :  { %797 = vsyncadd [#allocation3], 4294967040 }
  0x47   :  { %798 = dma.done.wait [#allocation6], 2048  }
  0x48   :  { %799 = vsyncadd [#allocation6], 4294965248 }
  0x49   :  { %800 = dma.done.wait [#allocation9], 1024  }
  0x4a   :  { %801 = vsyncadd [#allocation9], 4294966272  ;;  %v812_v0 = vmov 0.0   ;;  %v934_v1 = vld [vmem:[#allocation2] sm:$0xff]  ;;  %v936_v2 = vld [vmem:[#allocation2 + $0x8] sm:$0xff]  ;;  %vm813_vm0 = vmmov 0  }
  0x4b   :  { %579 = vmatprep.subr.bf16.mxu0 %v812_v0  ;;  %599 = vmatprep.subr.bf16.mxu1 %v812_v0  ;;  %v97_v3 = vmul.f32 %v934_v1, %v934_v1  ;;  %v98_v4 = vmul.f32 %v936_v2, %v936_v2  ;;  %v650_v5 = vld [vmem:[#allocation5] sm:$0xff]   ;;  %v651_v6 = vld [vmem:[#allocation5 + $0x8] sm:$0xff]   ;;  %v652_v7 = vld [vmem:[#allocation5 + $0x10] sm:$0xff]   ;;  %s814_s25 = smov [#allocation10]  }
  0x4c   :  { %91 = vadd.xlane.f32.xlu0 %v934_v1  ;;  %580 = vmatpush3.bf16.msra.mxu0 %v650_v5  ;;  %v653_v8 = vld [vmem:[#allocation5 + $0x18] sm:$0xff]   ;;  %v654_v9 = vld [vmem:[#allocation5 + $0x20] sm:$0xff]   ;;  %v655_v10 = vld [vmem:[#allocation5 + $0x28] sm:$0xff]   ;;  %s509_s26 = sshll.u32 %s814_s25, 4  ;;  %s510_s26 = int_to_ptr.vmem [resolvable:$true] %s509_s26 }
  0x4d   :  { %99 = vadd.xlane.f32.xlu1 %v97_v3  ;;  %581 = vmatprep.subr.bf16.mxu0 %v812_v0  ;;  %v656_v11 = vld [vmem:[#allocation5 + $0x30] sm:$0xff]   ;;  %v657_v12 = vld [vmem:[#allocation5 + $0x38] sm:$0xff]   ;;  %v658_v13 = vld [vmem:[#allocation7] sm:$0xff]   ;;  %s774_s27 = scalar_lea.vmem %s510_s26, 256  ;;  %p779_p5 = scmp.lt.s32.totalorder %s510_s26, %s510_s26 }
  0x4e   :  { %595 = vmatprep.mubr.msk.bf16.mxu0 %vm813_vm0, %v812_v0  ;;  %615 = vmatprep.mubr.msk.bf16.mxu1 %vm813_vm0, %v812_v0  ;;  %v659_v14 = vld [vmem:[#allocation7 + $0x8] sm:$0xff]   ;;  %v523_v32 = vld [vmem:[%s1007_s1] ss:$0 sm:$0xff]  ;;  %v661_v43 = vld [vmem:[#allocation7 + $0x18] sm:$0xff]   ;;  %p775_p4 = scmp.ne.s32.totalorder %s510_s26, %s774_s27  ;;  %p780_p6 = scmp.lt.s32.totalorder %s774_s27, %s774_s27 }
  0x4f   :  { %600 = vmatpush3.bf16.msra.mxu1 %v658_v13  ;;  %v524_v37 = vld [vmem:[%s1008_s2] ss:$0 sm:$0xff]  ;;  %v662_v44 = vld [vmem:[#allocation7 + $0x20] sm:$0xff]   ;;  %v663_v45 = vld [vmem:[#allocation7 + $0x28] sm:$0xff]  }
  0x50   :  { %93 = vadd.xlane.f32.xlu0 %v936_v2  ;;  %582 = vmatpush3.bf16.msra.mxu0 %v651_v6  ;;  %v660_v42 = vld [vmem:[#allocation7 + $0x10] sm:$0xff]   ;;  %v665_v47 = vld [vmem:[#allocation7 + $0x38] sm:$0xff]   ;;  %v666_v48 = vld [vmem:[#allocation8] sm:$0xff]   ;;  %p781_p7 = por %p780_p6, %p779_p5 }
  0x51   :  { %101 = vadd.xlane.f32.xlu1 %v98_v4  ;;  %583 = vmatprep.subr.bf16.mxu0 %v812_v0  ;;  %v664_v46 = vld [vmem:[#allocation7 + $0x30] sm:$0xff]   ;;  %v667_v49 = vld [vmem:[#allocation8 + $0x8] sm:$0xff]  }
  0x52   :  { %601 = vmatprep.subr.bf16.mxu1 %v812_v0  ;;  %v525_v50 = vld [vmem:[%s1010_s4] ss:$0 sm:$0xff]  ;;  %p782_p8 = pnand %p781_p7, %p775_p4 }
  0x53   :  { %602 = vmatpush3.bf16.msra.mxu1 %v659_v14  ;;  %v672_v13 = vld [vmem:[#allocation8 + $0x30] sm:$0xff]   ;;  %v673_v14 = vld [vmem:[#allocation8 + $0x38] sm:$0xff]  }
  0x54   :  { %584 = vmatpush3.bf16.msra.mxu0 %v652_v7  ;;  %603 = vmatprep.subr.bf16.mxu1 %v812_v0 }
  0x55   :  { %585 = vmatprep.subr.bf16.mxu0 %v812_v0 }
  0x57   :  { %604 = vmatpush3.bf16.msra.mxu1 %v660_v42 }
  0x58   :  { %586 = vmatpush3.bf16.msra.mxu0 %v653_v8  ;;  %605 = vmatprep.subr.bf16.mxu1 %v812_v0 }
  0x59   :  { %587 = vmatprep.subr.bf16.mxu0 %v812_v0 }
  0x5b   :  { %606 = vmatpush3.bf16.msra.mxu1 %v661_v43 }
  0x5c   :  { %588 = vmatpush3.bf16.msra.mxu0 %v654_v9  ;;  %607 = vmatprep.subr.bf16.mxu1 %v812_v0  ;;  %v668_v9 = vld [vmem:[#allocation8 + $0x10] sm:$0xff]  }
  0x5d   :  { %589 = vmatprep.subr.bf16.mxu0 %v812_v0 }
  0x5f   :  { %608 = vmatpush3.bf16.msra.mxu1 %v662_v44 }
  0x60   :  { %590 = vmatpush3.bf16.msra.mxu0 %v655_v10  ;;  %609 = vmatprep.subr.bf16.mxu1 %v812_v0  ;;  %v669_v10 = vld [vmem:[#allocation8 + $0x18] sm:$0xff]  }
  0x61   :  { %591 = vmatprep.subr.bf16.mxu0 %v812_v0 }
  0x63   :  { %610 = vmatpush3.bf16.msra.mxu1 %v663_v45 }
  0x64   :  { %592 = vmatpush3.bf16.msra.mxu0 %v656_v11  ;;  %611 = vmatprep.subr.bf16.mxu1 %v812_v0  ;;  %v670_v11 = vld [vmem:[#allocation8 + $0x20] sm:$0xff]  }
  0x65   :  { %593 = vmatprep.subr.bf16.mxu0 %v812_v0 }
  0x67   :  { %612 = vmatpush3.bf16.msra.mxu1 %v664_v46 }
  0x68   :  { %594 = vmatpush3.bf16.msra.mxu0 %v657_v12  ;;  %613 = vmatprep.subr.bf16.mxu1 %v812_v0  ;;  %v671_v12 = vld [vmem:[#allocation8 + $0x28] sm:$0xff]  }
  0x69   :  { %619 = vmatprep.subr.bf16.mxu0 %v812_v0 }
  0x6b   :  { %614 = vmatpush3.bf16.msra.mxu1 %v665_v47 }
  0xd9   :  { %v92_v15 = vpop.xlane.xlu0 %91 }
  0xda   :  { %v95_v16 = vmul.f32 0.03125, %v92_v15  ;;  %v100_v17 = vpop.xlane.xlu1 %99  ;;  %v534_v15 = vld [vmem:[%s1012_s6] ss:$0 sm:$0xff] }
  0xdb   :  { %v103_v19 = vmul.f32 0.03125, %v100_v17 }
  0xdc   :  { %v105_v18 = vmul.f32 %v95_v16, %v95_v16  ;;  %v109_v29 = vsub.f32 %v934_v1, %v95_v16 }
  0xdd   :  { %v94_v20 = vpop.xlane.xlu0 %93 }
  0xde   :  { %v107_v21 = vsub.f32 %v103_v19, %v105_v18  ;;  %v96_v22 = vmul.f32 0.03125, %v94_v20  ;;  %v102_v23 = vpop.xlane.xlu1 %101 }
  0xdf   :  { %v104_v26 = vmul.f32 0.03125, %v102_v23 }
  0xe0   :  { %v111_v24 = vadd.f32 1e-05, %v107_v21  ;;  %v106_v25 = vmul.f32 %v96_v22, %v96_v22  ;;  %v110_v33 = vsub.f32 %v936_v2, %v96_v22 }
  0xe2   :  { %674 = vrsqrt.f32 %v111_v24  ;;  %v108_v27 = vsub.f32 %v104_v26, %v106_v25 }
  0xe4   :  { %v112_v28 = vadd.f32 1e-05, %v108_v27 }
  0xe6   :  { %676 = vrsqrt.f32 %v112_v28 }
  0xec   :  { %v675_v30 = vpop.eup %674 }
  0xed   :  { %v115_v31 = vmul.f32 %v675_v30, %v109_v29 }
  0xef   :  { %v124_v36 = vmul.f32 %v523_v32, %v115_v31 }
  0xf0   :  { %v677_v34 = vpop.eup %676 }
  0xf1   :  { %v116_v35 = vmul.f32 %v677_v34, %v110_v33  ;;  %v133_v39 = vadd.f32 %v524_v37, %v124_v36  ;;  %v551_v33 = vld [vmem:[%s1014_s8] ss:$0 sm:$0xff] }
  0xf3   :  { %v125_v38 = vmul.f32 %v523_v32, %v116_v35 }
  0xf5   :  { %v134_v40 = vadd.f32 %v524_v37, %v125_v38 }
  0xf7   :  { %v135_v41 = vpack.c.bf16 %v134_v40, %v133_v39 }
  0xf9   :  { %596 = vmatmul.mubr.bf16.vlgmr.msra.gmra.mrb[0].mxu0 %v135_v41 }
  0xfa   :  { %635 = vmatprep.mubr.msk.bf16.mxu0 %vm813_vm0, %v812_v0  ;;  %620 = vmatpush3.bf16.msra.mxu0 %v666_v48 }
  0xfb   :  { %621 = vmatprep.subr.bf16.mxu0 %v812_v0 }
  0xfe   :  { %622 = vmatpush3.bf16.msra.mxu0 %v667_v49 }
  0xff   :  { %623 = vmatprep.subr.bf16.mxu0 %v812_v0 }
 0x102   :  { %624 = vmatpush3.bf16.msra.mxu0 %v668_v9 }
 0x103   :  { %625 = vmatprep.subr.bf16.mxu0 %v812_v0 }
 0x106   :  { %626 = vmatpush3.bf16.msra.mxu0 %v669_v10 }
 0x107   :  { %627 = vmatprep.subr.bf16.mxu0 %v812_v0 }
 0x10a   :  { %628 = vmatpush3.bf16.msra.mxu0 %v670_v11 }
 0x10b   :  { %629 = vmatprep.subr.bf16.mxu0 %v812_v0 }
 0x10e   :  { %630 = vmatpush3.bf16.msra.mxu0 %v671_v12 }
 0x10f   :  { %631 = vmatprep.subr.bf16.mxu0 %v812_v0 }
 0x112   :  { %632 = vmatpush3.bf16.msra.mxu0 %v672_v13 }
 0x113   :  { %633 = vmatprep.subr.bf16.mxu0 %v812_v0 }
 0x116   :  { %634 = vmatpush3.bf16.msra.mxu0 %v673_v14 }
 0x1cc   :  { %v241_v51 = vpop.f32.mrb[0].mxu0 }
 0x1cd   :  { %v242_v52 = vadd.f32 %v525_v50, %v241_v51  ;;  %v597_v53 = vpop.f32.mrb[1].mxu0 }
 0x1ce   :  { %v244_v54 = vpop.f32.mrb[2].mxu0 }
 0x1cf   :  { %v250_v55 = vmul.f32 0.70710677, %v242_v52  ;;  %v245_v56 = vadd.f32 %v525_v50, %v244_v54  ;;  %v598_v57 = vpop.f32.mrb[3].mxu0  ;;  %v248_v60 = vmul.f32 0.5, %v242_v52 }
 0x1d1   :  { %678 = verf.f32 %v250_v55  ;;  %v251_v58 = vmul.f32 0.70710677, %v245_v56  ;;  %v249_v3 = vmul.f32 0.5, %v245_v56 }
 0x1d3   :  { %680 = verf.f32 %v251_v58 }
 0x1db   :  { %v679_v59 = vpop.eup %678 }
 0x1dc   :  { %v254_v61 = vadd.f32 1.0, %v679_v59 }
 0x1dd   :  { %v681_v62 = vpop.eup %680 }
 0x1de   :  { %v256_v63 = vmul.f32 %v254_v61, %v248_v60  ;;  %v255_v4 = vadd.f32 1.0, %v681_v62 }
 0x1e0   :  { %v257_v5 = vmul.f32 %v255_v4, %v249_v3  ;;  %v258_v6 = vadd.f32 %v256_v63, %v133_v39 }
 0x1e2   :  { %v259_v7 = vadd.f32 %v257_v5, %v134_v40 }
 0x1e4   :  { %v260_v8 = vpack.c.bf16 %v259_v7, %v258_v6 }
 0x1e6   :  { %616 = vmatmul.mubr.bf16.vlgmr.msra.gmra.mrb[0].mxu1 %v260_v8 }
 0x2b9   :  { %v366_v16 = vpop.f32.mrb[0].mxu1 }
 0x2ba   :  { %v367_v17 = vadd.f32 %v534_v15, %v366_v16  ;;  %v617_v18 = vpop.f32.mrb[1].mxu1 }
 0x2bb   :  { %v369_v19 = vpop.f32.mrb[2].mxu1 }
 0x2bc   :  { %v375_v20 = vmul.f32 0.70710677, %v367_v17  ;;  %v370_v21 = vadd.f32 %v534_v15, %v369_v19  ;;  %v618_v22 = vpop.f32.mrb[3].mxu1  ;;  %v373_v0 = vmul.f32 0.5, %v367_v17 }
 0x2be   :  { %682 = verf.f32 %v375_v20  ;;  %v376_v23 = vmul.f32 0.70710677, %v370_v21  ;;  %v374_v27 = vmul.f32 0.5, %v370_v21 }
 0x2c0   :  { %684 = verf.f32 %v376_v23 }
 0x2c8   :  { %v683_v24 = vpop.eup %682 }
 0x2c9   :  { %v379_v25 = vadd.f32 1.0, %v683_v24 }
 0x2ca   :  { %v685_v26 = vpop.eup %684 }
 0x2cb   :  { %v380_v28 = vadd.f32 1.0, %v685_v26  ;;  %v381_v29 = vmul.f32 %v379_v25, %v373_v0 }
 0x2cd   :  { %v382_v30 = vmul.f32 %v380_v28, %v374_v27 }
 0x2cf   :  { %v383_v31 = vpack.c.bf16 %v382_v30, %v381_v29 }
 0x2d1   :  { %636 = vmatmul.mubr.bf16.vlgmr.msra.gmra.mrb[4].mxu0 %v383_v31 }
 0x3a4   :  { %v482_v32 = vpop.f32.mrb[4].mxu0 }
 0x3a5   :  { %v489_v34 = vadd.f32 %v482_v32, %v258_v6  ;;  %v637_v35 = vpop.f32.mrb[5].mxu0 }
 0x3a6   :  { %v485_v36 = vpop.f32.mrb[6].mxu0 }
 0x3a7   :  { %v498_v37 = vadd.f32 %v551_v33, %v489_v34  ;;  %v490_v38 = vadd.f32 %v485_v36, %v259_v7  ;;  %v638_v39 = vpop.f32.mrb[7].mxu0 }
 0x3a9   :  { %v500_v40 = vadd.f32 %v498_v37, %v934_v1  ;;  %v499_v41 = vadd.f32 %v551_v33, %v490_v38 }
 0x3ab   :  { %502 = vst [vmem:[#allocation10] sm:$0xff] %v500_v40  ;;  %v501_v42 = vadd.f32 %v499_v41, %v936_v2 }
 0x3ad   :  { %503 = vst [vmem:[#allocation10 + $0x8] sm:$0xff] %v501_v42 }
 0x3ae   :  { %785 = shalt.err (!%p782_p8)
}
 0x3af   :  { %s786_s0 = scalar_lea.hbm %s1015_s9, 256 }
 0x3b0   :  { %p787_p9 = scmp.ne.s32.totalorder %s1015_s9, %s786_s0  ;;  %p790_p10 = scmp.lt.u32.totalorder %s786_s0, %s1015_s9 }
 0x3b2   :  { %p792_p11 = pnand %p790_p10, %p787_p9 }
 0x3b4   :  { %795 = shalt.err (!%p792_p11)
}
 0x3b5   :  { %515 = dma.vmem_to_hbm [thread:$0]  %s510_s26, 256, %s1015_s9, [#allocation4], %s808_s3, %s808_s3, %s809_s10  }
 0x3b6   :  { %802 = dma.done.wait [#allocation4], 256  }
 0x3b7   :  { %803 = vsyncadd [#allocation4], 4294967040 }
 0x3b8   :  { %519 = vsyncpa [#allocation3], 1 }
 0x3b9   :  { %520 = vsyncpa [#allocation6], 1 }
 0x3ba   :  { %521 = vsyncpa [#allocation9], 1 }
 0x3bb   :  { %522 = vsyncpa [#allocation4], 1 }

</bundles_post_ra>
